<compile_context>
chip_gen: v6e
topology: v6e:2x2x1
jax: 0.10.0
libtpu: 0.0.40
codegen_flags: <defaults>
</compile_context>

<pallas_src>
import functools
import math

import jax
import jax.numpy as jnp
from jax.experimental import pallas as pl
from jax.experimental.pallas import tpu as pltpu


def _round_up(x: int, m: int) -> int:
    return ((x + m - 1) // m) * m


def _equal_linear_kernel_single_k(x_ref, w_ref, b_ref, o_ref, *, scale):
    # x_ref: (tm, K)  w_ref: (K, tn)  b_ref: (1, tn)  o_ref: (tm, tn)
    acc = jnp.dot(x_ref[...], w_ref[...], preferred_element_type=jnp.float32)
    o_ref[...] = (acc * scale + b_ref[...].astype(jnp.float32)).astype(o_ref.dtype)


def _equal_linear_kernel_multi_k(x_ref, w_ref, b_ref, o_ref, acc_ref, *, scale):
    # x_ref: (tm, tk)  w_ref: (tk, tn)  b_ref: (1, tn)  o_ref: (tm, tn)
    # acc_ref: (tm, tn) f32 scratch, resident across the K grid axis.
    k = pl.program_id(2)

    @pl.when(k == 0)
    def _():
        acc_ref[...] = jnp.zeros_like(acc_ref)

    acc_ref[...] += jnp.dot(
        x_ref[...], w_ref[...], preferred_element_type=jnp.float32
    )

    @pl.when(k == pl.num_programs(2) - 1)
    def _():
        o_ref[...] = (
            acc_ref[...] * scale + b_ref[...].astype(jnp.float32)
        ).astype(o_ref.dtype)


def equal_linear(x, weight_orig, bias, *, tm_max=512, tn_max=512, tk_max=1024):
    """EqualLinear forward: x @ (weight_orig * sqrt(2/in_dim)).T + bias.

    x:           (B, in_dim)
    weight_orig: (out_dim, in_dim)   (PyTorch nn.Linear convention)
    bias:        (out_dim,)
    """
    B, in_dim = x.shape
    out_dim = weight_orig.shape[0]
    scale = math.sqrt(2.0 / in_dim)  # fan_in = in_dim; trace-time constant

    # Tiny-problem fast path: pallas_call launch/per-step overhead dominates
    # sub-vreg problems; let XLA fuse it.
    if B < 8 or in_dim < 128 or out_dim < 128:
        w_eff = (weight_orig.astype(jnp.float32) * scale).astype(x.dtype)
        acc = jnp.dot(x, w_eff.T, preferred_element_type=jnp.float32)
        return (acc + bias.astype(jnp.float32)).astype(x.dtype)

    # Pre-transpose once -> plain (M,K)x(K,N) MXU contraction (lane-dense out).
    w_t = weight_orig.T.astype(x.dtype)          # (in_dim, out_dim)
    b2d = bias.reshape(1, out_dim)

    in_sz = jnp.dtype(x.dtype).itemsize
    out_sz = in_sz
    b_sz = jnp.dtype(bias.dtype).itemsize
    sub_m = max(8, 32 // in_sz)                  # dtype-native sublane multiple

    # Generation-aware VMEM budget (v7x: 64 MiB/TC, v5e/v6e: 128 MiB).
    try:
        vmem_cap = pltpu.get_tpu_info().vmem_capacity_bytes
    except Exception:
        vmem_cap = 64 << 20                      # conservative (v7x-sized) fallback
    vmem_limit = int(vmem_cap * 0.8)             # leave compiler-scratch headroom
    work_budget = int(vmem_cap * 0.4)            # double-buffered working-set cap

    tm = min(tm_max, _round_up(B, sub_m))
    tn = min(tn_max, _round_up(out_dim, 128))

    def single_k_bytes(tm_, tn_):
        return (2 * tm_ * in_dim * in_sz + 2 * in_dim * tn_ * in_sz
                + 2 * tm_ * tn_ * out_sz + 2 * tn_ * b_sz + tm_ * tn_ * 4)

    def multi_k_bytes(tm_, tn_, tk_):
        return (2 * tm_ * tk_ * in_sz + 2 * tk_ * tn_ * in_sz
                + 2 * tm_ * tn_ * out_sz + 2 * tn_ * b_sz + tm_ * tn_ * 4)

    single_k = single_k_bytes(tm, tn) <= work_budget

    # Keep both v7x TensorCores busy: ensure >= 2 parallel (i, j) blocks when
    # the output can actually be split along N (lane-dim stays a 128 multiple).
    if pl.cdiv(B, tm) * pl.cdiv(out_dim, tn) < 2 and out_dim > 128:
        tn = _round_up(pl.cdiv(out_dim, 2), 128)

    gm, gn = pl.cdiv(B, tm), pl.cdiv(out_dim, tn)

    cost = pl.CostEstimate(
        flops=2 * B * in_dim * out_dim,
        transcendentals=0,
        bytes_accessed=(B * in_dim * in_sz + in_dim * out_dim * in_sz
                        + out_dim * b_sz + B * out_dim * out_sz),
    )
    params = pltpu.CompilerParams(
        dimension_semantics=(("parallel", "parallel") if single_k
                             else ("parallel", "parallel", "arbitrary")),
        vmem_limit_bytes=vmem_limit,
    )

    if single_k:
        # Whole contraction dim resident per tile: no accumulator, no K axis,
        # no pl.when branches. Pallas masks the M/N edge blocks, so no M/N pad.
        return pl.pallas_call(
            functools.partial(_equal_linear_kernel_single_k, scale=scale),
            out_shape=jax.ShapeDtypeStruct((B, out_dim), x.dtype),
            grid_spec=pltpu.PrefetchScalarGridSpec(
                num_scalar_prefetch=0,
                grid=(gm, gn),
                in_specs=[
                    pl.BlockSpec((tm, in_dim), lambda i, j: (i, 0)),  # x tile
                    pl.BlockSpec((in_dim, tn), lambda i, j: (0, j)),  # W^T tile
                    pl.BlockSpec((1, tn), lambda i, j: (0, j)),       # bias tile
                ],
                out_specs=pl.BlockSpec((tm, tn), lambda i, j: (i, j)),
            ),
            compiler_params=params,
            cost_estimate=cost,
        )(x, w_t, b2d)

    # ---- Large-K fallback: tiled reduction with an f32 VMEM accumulator ----
    tk = tk_max
    while tk > 256 and multi_k_bytes(tm, tn, tk) > work_budget:
        tk //= 2
    while tn > 128 and multi_k_bytes(tm, tn, tk) > work_budget:
        tn = max(128, tn // 2)
    while tm > sub_m and multi_k_bytes(tm, tn, tk) > work_budget:
        tm = max(sub_m, _round_up(tm // 2, sub_m))
    gm, gn = pl.cdiv(B, tm), pl.cdiv(out_dim, tn)

    # K must stay zero-padded: OOB garbage along K would corrupt the reduction.
    Kp = _round_up(in_dim, tk)
    if Kp != in_dim:
        x = jnp.pad(x, ((0, 0), (0, Kp - in_dim)))
        w_t = jnp.pad(w_t, ((0, Kp - in_dim), (0, 0)))

    return pl.pallas_call(
        functools.partial(_equal_linear_kernel_multi_k, scale=scale),
        out_shape=jax.ShapeDtypeStruct((B, out_dim), x.dtype),
        grid_spec=pltpu.PrefetchScalarGridSpec(
            num_scalar_prefetch=0,
            grid=(gm, gn, Kp // tk),
            in_specs=[
                pl.BlockSpec((tm, tk), lambda i, j, k: (i, k)),   # x tile
                pl.BlockSpec((tk, tn), lambda i, j, k: (k, j)),   # W^T tile
                pl.BlockSpec((1, tn), lambda i, j, k: (0, j)),    # bias tile
            ],
            out_specs=pl.BlockSpec((tm, tn), lambda i, j, k: (i, j)),
            scratch_shapes=[pltpu.VMEM((tm, tn), jnp.float32)],
        ),
        compiler_params=params,
        cost_estimate=cost,
    )(x, w_t, b2d)


if __name__ == "__main__":
    key = jax.random.PRNGKey(0)
    kx, kw, kb, kx2, kw2 = jax.random.split(key, 5)

    # --- Pallas path: shapes large enough to exercise the kernel ---
    B, in_dim, out_dim = 64, 256, 128
    x = jax.random.normal(kx, (B, in_dim), dtype=jnp.float32)
    # weight.data.normal_() -> standard normal; bias.data.zero_()
    weight_orig = jax.random.normal(kw, (out_dim, in_dim), dtype=jnp.float32)
    bias = jnp.zeros((out_dim,), dtype=jnp.float32)

    out = jax.block_until_ready(equal_linear(x, weight_orig, bias))
    scale = math.sqrt(2.0 / in_dim)
    ref = x @ (weight_orig * scale).T + bias
    assert out.shape == (B, out_dim)
    assert jnp.allclose(out, ref, atol=2e-2, rtol=2e-2), float(
        jnp.max(jnp.abs(out - ref))
    )

    # Same forward with a non-zero bias (exercises the bias stream).
    bias_nz = jax.random.normal(kb, (out_dim,), dtype=jnp.float32)
    out_nz = jax.block_until_ready(equal_linear(x, weight_orig, bias_nz))
    ref_nz = x @ (weight_orig * scale).T + bias_nz
    assert jnp.allclose(out_nz, ref_nz, atol=2e-2, rtol=2e-2)

    # --- tiny-problem fast path (module's natural small shapes) ---
    B2, in2, out2 = 8, 32, 16
    x2 = jax.random.normal(kx2, (B2, in2), dtype=jnp.float32)
    w2 = jax.random.normal(kw2, (out2, in2), dtype=jnp.float32)
    b2 = jnp.zeros((out2,), dtype=jnp.float32)
    out2_v = jax.block_until_ready(equal_linear(x2, w2, b2))
    ref2 = x2 @ (w2 * math.sqrt(2.0 / in2)).T + b2
    assert jnp.allclose(out2_v, ref2, atol=1e-4, rtol=1e-4)

    print("KERNEL_OK")
</pallas_src>

<mosaic_0001>
module attributes {stable_mosaic.version = 11 : i64} {
  func.func @_equal_linear_kernel_single_k(%arg0: i32, %arg1: i32, %arg2: memref<64x256xf32, #tpu.memory_space<vmem>>, %arg3: memref<256x128xf32, #tpu.memory_space<vmem>>, %arg4: memref<1x128xf32, #tpu.memory_space<vmem>>, %arg5: memref<64x128xf32, #tpu.memory_space<vmem>>) attributes {dimension_semantics = [#tpu.dimension_semantics<parallel>, #tpu.dimension_semantics<parallel>], iteration_bounds = array<i64: 1, 1>, scalar_prefetch = 0 : i64, scratch_operands = 0 : i64, tpu.core_type = #tpu.core_type<tc>, window_params = [{transform_indices = @transform_0, window_bounds = array<i64: 64, 256>}, {transform_indices = @transform_1, window_bounds = array<i64: 256, 128>}, {transform_indices = @transform_2, window_bounds = array<i64: 1, 128>}, {transform_indices = @transform_3, window_bounds = array<i64: 64, 128>}]} {
    %c0 = arith.constant 0 : index
    %c0_0 = arith.constant 0 : index
    %0 = vector.load %arg2[%c0, %c0_0] : memref<64x256xf32, #tpu.memory_space<vmem>>, vector<64x256xf32>
    %c0_1 = arith.constant 0 : index
    %c0_2 = arith.constant 0 : index
    %1 = vector.load %arg3[%c0_1, %c0_2] : memref<256x128xf32, #tpu.memory_space<vmem>>, vector<256x128xf32>
    %cst = arith.constant dense<0.000000e+00> : vector<64x128xf32>
    %2 = tpu.matmul %0, %1, %cst {dimension_numbers = #tpu.dot_dimension_numbers<[1], [0], [0], [1], [0, 0, 1, 1], [], []>} : vector<64x256xf32>, vector<256x128xf32>, vector<64x128xf32> -> vector<64x128xf32>
    %cst_3 = arith.constant 0.0883883461 : f32
    %3 = vector.broadcast %cst_3 : f32 to vector<64x128xf32>
    %4 = arith.mulf %2, %3 : vector<64x128xf32>
    %c0_4 = arith.constant 0 : index
    %c0_5 = arith.constant 0 : index
    %5 = vector.load %arg4[%c0_4, %c0_5] : memref<1x128xf32, #tpu.memory_space<vmem>>, vector<1x128xf32>
    %6 = vector.broadcast %5 : vector<1x128xf32> to vector<64x128xf32>
    %7 = arith.addf %4, %6 : vector<64x128xf32>
    %c0_6 = arith.constant 0 : index
    %c0_7 = arith.constant 0 : index
    %8 = vector.load %arg5[%c0_6, %c0_7] : memref<64x128xf32, #tpu.memory_space<vmem>>, vector<64x128xf32>
    tpu.vector_store %arg5[%c0_6, %c0_7], %7 {strides = array<i32>} : memref<64x128xf32, #tpu.memory_space<vmem>>, vector<64x128xf32>,
    return
  }
  func.func @transform_0(%arg0: i32, %arg1: i32) -> (i32, i32) {
    %c0_i32 = arith.constant 0 : i32
    %c0_i32_0 = arith.constant 0 : i32
    return %arg0, %c0_i32 : i32, i32
  }
  func.func @transform_1(%arg0: i32, %arg1: i32) -> (i32, i32) {
    %c0_i32 = arith.constant 0 : i32
    %c0_i32_0 = arith.constant 0 : i32
    return %c0_i32, %arg1 : i32, i32
  }
  func.func @transform_2(%arg0: i32, %arg1: i32) -> (i32, i32) {
    %c0_i32 = arith.constant 0 : i32
    %c0_i32_0 = arith.constant 0 : i32
    return %c0_i32, %arg1 : i32, i32
  }
  func.func @transform_3(%arg0: i32, %arg1: i32) -> (i32, i32) {
    %c0_i32 = arith.constant 0 : i32
    return %arg0, %arg1 : i32, i32
  }
}

</mosaic_0001>

<bundles_post_ra>
// kernel: tpu_custom_call.1
= control target key start
LH: loop header
LB: loop body
LE: loop exit
PB: predicated region body
PF: predicated region fallthrough
CT: control target
= control target key end

     0   :  { %8 = vsyncpa [#allocation3], 0  ;;  %s452_s0 = inlined_call_operand.hbm [shape: f32[64,256], index: 0, kind: input, shape index: {}]   ;;  %s453_s1 = inlined_call_operand.hbm [shape: f32[256,128], index: 1, kind: input, shape index: {}]   ;;  %s454_s2 = inlined_call_operand.vmem [shape: f32[1,128], index: 2, kind: input, shape index: {}]   ;;  %s455_s3 = inlined_call_operand.hbm [shape: f32[64,128], index: 3, kind: output, shape index: {}]  }
   0x1   :  { %9 = vsyncpa [#allocation6], 0 }
   0x2   :  { %10 = vsyncpa [#allocation4], 0  ;;  %s407_s12 = smov [#allocation2]  }
   0x3   :  { %s16_s13 = sshll.u32 %s407_s12, 4  ;;  %s17_s13 = int_to_ptr.vmem [resolvable:$true] %s16_s13 }
   0x4   :  { %s349_s14 = scalar_lea.vmem %s17_s13, 2048  ;;  %p354_p1 = scmp.lt.s32.totalorder %s17_s13, %s17_s13 }
   0x5   :  { %p350_p0 = scmp.ne.s32.totalorder %s17_s13, %s349_s14  ;;  %p355_p2 = scmp.lt.s32.totalorder %s349_s14, %s349_s14 }
   0x7   :  { %p356_p3 = por %p355_p2, %p354_p1 }
   0x9   :  { %p357_p4 = pnand %p356_p3, %p350_p0 }
   0xb   :  { %360 = shalt.err (!%p357_p4)
}
   0xc   :  { %s408_s15 = smov 256   ;;  %s409_s16 = smov 16  }
   0xd   :  { %22 = dma.hbm_to_vmem [thread:$0]  %s452_s0, 2048, %s17_s13, [#allocation3], %s408_s15, %s408_s15, %s409_s16  }
   0xe   :  { %s410_s19 = smov [#allocation5]  }
   0xf   :  { %s28_s20 = sshll.u32 %s410_s19, 4  ;;  %s29_s20 = int_to_ptr.vmem [resolvable:$true] %s28_s20 }
  0x10   :  { %s369_s21 = scalar_lea.vmem %s29_s20, 4096  ;;  %p374_p6 = scmp.lt.s32.totalorder %s29_s20, %s29_s20 }
  0x11   :  { %p370_p5 = scmp.ne.s32.totalorder %s29_s20, %s369_s21  ;;  %p375_p7 = scmp.lt.s32.totalorder %s369_s21, %s369_s21 }
  0x13   :  { %p376_p8 = por %p375_p7, %p374_p6 }
  0x15   :  { %p377_p9 = pnand %p376_p8, %p370_p5 }
  0x17   :  { %380 = shalt.err (!%p377_p9)
}
  0x18   :  { %s411_s22 = smov 128   ;;  %s412_s23 = smov 8  }
  0x19   :  { %34 = dma.hbm_to_vmem [thread:$0]  %s453_s1, 4096, %s29_s20, [#allocation6], %s411_s22, %s411_s22, %s412_s23  }
  0x1a   :  { %401 = dma.done.wait [#allocation3], 2048  }
  0x1b   :  { %402 = vsyncadd [#allocation3], 4294965248 }
  0x1c   :  { %403 = dma.done.wait [#allocation6], 4096  }
  0x1d   :  { %404 = vsyncadd [#allocation6], 4294963200  ;;  %v90_v0 = vld [vmem:[#allocation5 + $0xf8] sm:$0xff]  ;;  %v89_v2 = vld [vmem:[#allocation5 + $0xf0] sm:$0xff] }
  0x1e   :  { %v74_v1 = vld [vmem:[#allocation5 + $0x78] sm:$0xff]  ;;  %246 = vmatprep.subr.mxu0 %v90_v0  ;;  %302 = vmatprep.subr.mxu1 %v90_v0  ;;  %v73_v3 = vld [vmem:[#allocation5 + $0x70] sm:$0xff]  ;;  %v88_v4 = vld [vmem:[#allocation5 + $0xe8] sm:$0xff] }
  0x1f   :  { %247 = vmatpush3.msra.mxu0 %v74_v1  ;;  %318 = vmatpush3.msra.mxu1 %v74_v1  ;;  %v72_v5 = vld [vmem:[#allocation5 + $0x68] sm:$0xff]  ;;  %v87_v6 = vld [vmem:[#allocation5 + $0xe0] sm:$0xff]  ;;  %v86_v8 = vld [vmem:[#allocation5 + $0xd8] sm:$0xff] }
  0x20   :  { %248 = vmatprep.subr.mxu0 %v89_v2  ;;  %303 = vmatprep.subr.mxu1 %v89_v2  ;;  %v71_v7 = vld [vmem:[#allocation5 + $0x60] sm:$0xff]  ;;  %v70_v9 = vld [vmem:[#allocation5 + $0x58] sm:$0xff]  ;;  %v85_v10 = vld [vmem:[#allocation5 + $0xd0] sm:$0xff] }
  0x21   :  { %249 = vmatpush3.msra.mxu0 %v73_v3  ;;  %319 = vmatpush3.msra.mxu1 %v73_v3  ;;  %v69_v11 = vld [vmem:[#allocation5 + $0x50] sm:$0xff]  ;;  %v84_v12 = vld [vmem:[#allocation5 + $0xc8] sm:$0xff]  ;;  %v83_v14 = vld [vmem:[#allocation5 + $0xc0] sm:$0xff] }
  0x22   :  { %250 = vmatprep.subr.mxu0 %v88_v4  ;;  %304 = vmatprep.subr.mxu1 %v88_v4  ;;  %v68_v13 = vld [vmem:[#allocation5 + $0x48] sm:$0xff]  ;;  %v67_v15 = vld [vmem:[#allocation5 + $0x40] sm:$0xff]  ;;  %v82_v16 = vld [vmem:[#allocation5 + $0xb8] sm:$0xff] }
  0x23   :  { %251 = vmatpush3.msra.mxu0 %v72_v5  ;;  %320 = vmatpush3.msra.mxu1 %v72_v5  ;;  %v66_v17 = vld [vmem:[#allocation5 + $0x38] sm:$0xff]  ;;  %v81_v18 = vld [vmem:[#allocation5 + $0xb0] sm:$0xff]  ;;  %v80_v20 = vld [vmem:[#allocation5 + $0xa8] sm:$0xff] }
  0x24   :  { %252 = vmatprep.subr.mxu0 %v87_v6  ;;  %305 = vmatprep.subr.mxu1 %v87_v6  ;;  %v65_v19 = vld [vmem:[#allocation5 + $0x30] sm:$0xff]  ;;  %v64_v21 = vld [vmem:[#allocation5 + $0x28] sm:$0xff]  ;;  %v79_v22 = vld [vmem:[#allocation5 + $0xa0] sm:$0xff] }
  0x25   :  { %253 = vmatpush3.msra.mxu0 %v71_v7  ;;  %321 = vmatpush3.msra.mxu1 %v71_v7  ;;  %v63_v23 = vld [vmem:[#allocation5 + $0x20] sm:$0xff]  ;;  %v78_v24 = vld [vmem:[#allocation5 + $0x98] sm:$0xff]  ;;  %v77_v26 = vld [vmem:[#allocation5 + $0x90] sm:$0xff] }
  0x26   :  { %254 = vmatprep.subr.mxu0 %v86_v8  ;;  %306 = vmatprep.subr.mxu1 %v86_v8  ;;  %v62_v25 = vld [vmem:[#allocation5 + $0x18] sm:$0xff]  ;;  %v61_v27 = vld [vmem:[#allocation5 + $0x10] sm:$0xff]  ;;  %v76_v28 = vld [vmem:[#allocation5 + $0x88] sm:$0xff] }
  0x27   :  { %255 = vmatpush3.msra.mxu0 %v70_v9  ;;  %322 = vmatpush3.msra.mxu1 %v70_v9  ;;  %v60_v29 = vld [vmem:[#allocation5 + $0x8] sm:$0xff]  ;;  %v75_v30 = vld [vmem:[#allocation5 + $0x80] sm:$0xff]  ;;  %v46_v36 = vld [vmem:[#allocation2 + $0x18] sm:$0xff] }
  0x28   :  { %256 = vmatprep.subr.mxu0 %v85_v10  ;;  %307 = vmatprep.subr.mxu1 %v85_v10  ;;  %v59_v31 = vld [vmem:[#allocation5] sm:$0xff]  ;;  %v44_v32 = vld [vmem:[#allocation2 + $0x8] sm:$0xff]  ;;  %v54_v37 = vld [vmem:[#allocation2 + $0x58] sm:$0xff] }
  0x29   :  { %257 = vmatpush3.msra.mxu0 %v69_v11  ;;  %323 = vmatpush3.msra.mxu1 %v69_v11  ;;  %v52_v33 = vld [vmem:[#allocation2 + $0x48] sm:$0xff]  ;;  %v43_v34 = vld [vmem:[#allocation2] sm:$0xff]  ;;  %v45_v38 = vld [vmem:[#allocation2 + $0x10] sm:$0xff] }
  0x2a   :  { %258 = vmatprep.subr.mxu0 %v84_v12  ;;  %308 = vmatprep.subr.mxu1 %v84_v12  ;;  %v51_v35 = vld [vmem:[#allocation2 + $0x40] sm:$0xff]  ;;  %v53_v39 = vld [vmem:[#allocation2 + $0x50] sm:$0xff]  ;;  %v48_v40 = vld [vmem:[#allocation2 + $0x28] sm:$0xff] }
  0x2b   :  { %259 = vmatpush3.msra.mxu0 %v68_v13  ;;  %324 = vmatpush3.msra.mxu1 %v68_v13  ;;  %v56_v41 = vld [vmem:[#allocation2 + $0x68] sm:$0xff]  ;;  %v47_v42 = vld [vmem:[#allocation2 + $0x20] sm:$0xff]  ;;  %v50_v44 = vld [vmem:[#allocation2 + $0x38] sm:$0xff] }
  0x2c   :  { %260 = vmatprep.subr.mxu0 %v83_v14  ;;  %309 = vmatprep.subr.mxu1 %v83_v14  ;;  %v55_v43 = vld [vmem:[#allocation2 + $0x60] sm:$0xff]  ;;  %v58_v45 = vld [vmem:[#allocation2 + $0x78] sm:$0xff]  ;;  %v49_v46 = vld [vmem:[#allocation2 + $0x30] sm:$0xff] }
  0x2d   :  { %261 = vmatpush3.msra.mxu0 %v67_v15  ;;  %325 = vmatpush3.msra.mxu1 %v67_v15  ;;  %v57_v47 = vld [vmem:[#allocation2 + $0x70] sm:$0xff]  ;;  %v245_v54 = vld [vmem:[%s454_s2] ss:$0 sm:$0xff]  ;;  %s413_s2 = smov [#allocation7]  }
  0x2e   :  { %262 = vmatprep.subr.mxu0 %v82_v16  ;;  %310 = vmatprep.subr.mxu1 %v82_v16  ;;  %s232_s26 = sshll.u32 %s413_s2, 4  ;;  %s233_s26 = int_to_ptr.vmem [resolvable:$true] %s232_s26 }
  0x2f   :  { %263 = vmatpush3.msra.mxu0 %v66_v17  ;;  %326 = vmatpush3.msra.mxu1 %v66_v17  ;;  %s381_s27 = scalar_lea.vmem %s233_s26, 1024  ;;  %p386_p11 = scmp.lt.s32.totalorder %s233_s26, %s233_s26 }
  0x30   :  { %264 = vmatprep.subr.mxu0 %v81_v18  ;;  %311 = vmatprep.subr.mxu1 %v81_v18  ;;  %p382_p10 = scmp.ne.s32.totalorder %s233_s26, %s381_s27  ;;  %p387_p12 = scmp.lt.s32.totalorder %s381_s27, %s381_s27 }
  0x31   :  { %265 = vmatpush3.msra.mxu0 %v65_v19  ;;  %327 = vmatpush3.msra.mxu1 %v65_v19 }
  0x32   :  { %266 = vmatprep.subr.mxu0 %v80_v20  ;;  %312 = vmatprep.subr.mxu1 %v80_v20  ;;  %p388_p13 = por %p387_p12, %p386_p11 }
  0x33   :  { %267 = vmatpush3.msra.mxu0 %v64_v21  ;;  %328 = vmatpush3.msra.mxu1 %v64_v21 }
  0x34   :  { %268 = vmatprep.subr.mxu0 %v79_v22  ;;  %313 = vmatprep.subr.mxu1 %v79_v22  ;;  %p389_p0 = pnand %p388_p13, %p382_p10 }
  0x35   :  { %269 = vmatpush3.msra.mxu0 %v63_v23  ;;  %329 = vmatpush3.msra.mxu1 %v63_v23 }
  0x36   :  { %270 = vmatprep.subr.mxu0 %v78_v24  ;;  %314 = vmatprep.subr.mxu1 %v78_v24 }
  0x37   :  { %271 = vmatpush3.msra.mxu0 %v62_v25  ;;  %330 = vmatpush3.msra.mxu1 %v62_v25 }
  0x38   :  { %272 = vmatprep.subr.mxu0 %v77_v26  ;;  %315 = vmatprep.subr.mxu1 %v77_v26 }
  0x39   :  { %273 = vmatpush3.msra.mxu0 %v61_v27  ;;  %331 = vmatpush3.msra.mxu1 %v61_v27 }
  0x3a   :  { %274 = vmatprep.subr.mxu0 %v76_v28  ;;  %316 = vmatprep.subr.mxu1 %v76_v28 }
  0x3b   :  { %275 = vmatpush3.msra.mxu0 %v60_v29  ;;  %332 = vmatpush3.msra.mxu1 %v60_v29 }
  0x3c   :  { %276 = vmatprep.subr.mxu0 %v75_v30  ;;  %317 = vmatprep.subr.mxu1 %v75_v30 }
  0x3d   :  { %277 = vmatpush3.msra.mxu0 %v59_v31  ;;  %333 = vmatpush3.msra.mxu1 %v59_v31 }
  0x3e   :  { %155 = vmatprep.mubr.f32.mxu0 %v44_v32  ;;  %175 = vmatprep.mubr.f32.mxu1 %v52_v33 }
  0x3f   :  { %156 = vmatmul.mubr.f32.vlgmr.msra.gmra.mxu0 %v43_v34  ;;  %176 = vmatmul.mubr.f32.vlgmr.msra.gmra.mxu1 %v51_v35 }
  0x40   :  { %160 = vmatprep.mubr.f32.mxu0 %v46_v36  ;;  %180 = vmatprep.mubr.f32.mxu1 %v54_v37 }
  0x43   :  { %161 = vmatmul.mubr.f32.gmra.mxu0 %v45_v38  ;;  %181 = vmatmul.mubr.f32.gmra.mxu1 %v53_v39 }
  0x44   :  { %165 = vmatprep.mubr.f32.mxu0 %v48_v40  ;;  %185 = vmatprep.mubr.f32.mxu1 %v56_v41 }
  0x47   :  { %166 = vmatmul.mubr.f32.gmra.mxu0 %v47_v42  ;;  %186 = vmatmul.mubr.f32.gmra.mxu1 %v55_v43 }
  0x48   :  { %170 = vmatprep.mubr.f32.mxu0 %v50_v44  ;;  %190 = vmatprep.mubr.f32.mxu1 %v58_v45 }
  0x4b   :  { %171 = vmatmul.mubr.f32.gmra.mxu0 %v49_v46  ;;  %191 = vmatmul.mubr.f32.gmra.mxu1 %v57_v47 }
  0xff   :  { %v278_v48 = vpop.f32.mrf.mxu0  ;;  %v290_v49 = vpop.f32.mrf.mxu1 }
 0x101   :  { %v279_v50 = vpop.f32.mrf.mxu0  ;;  %v291_v51 = vpop.f32.mrf.mxu1 }
 0x102   :  { %v280_v52 = vadd.f32 %v279_v50, %v278_v48  ;;  %v292_v53 = vadd.f32 %v291_v51, %v290_v49 }
 0x103   :  { %v281_v55 = vpop.f32.mrf.mxu0  ;;  %v293_v56 = vpop.f32.mrf.mxu1 }
 0x104   :  { %v196_v57 = vmul.f32 0.088388346, %v280_v52  ;;  %v200_v58 = vmul.f32 0.088388346, %v292_v53 }
 0x105   :  { %v282_v59 = vpop.f32.mrf.mxu0  ;;  %v294_v60 = vpop.f32.mrf.mxu1 }
 0x106   :  { %v211_v61 = vadd.f32 %v245_v54, %v196_v57  ;;  %v215_v62 = vadd.f32 %v245_v54, %v200_v58  ;;  %v283_v63 = vadd.f32 %v282_v59, %v281_v55  ;;  %v295_v0 = vadd.f32 %v294_v60, %v293_v56 }
 0x107   :  { %v284_v1 = vpop.f32.mrf.mxu0  ;;  %v296_v2 = vpop.f32.mrf.mxu1 }
 0x108   :  { %219 = vst [vmem:[#allocation7] sm:$0xff] %v211_v61  ;;  %223 = vst [vmem:[#allocation7 + $0x20] sm:$0xff] %v215_v62  ;;  %v197_v3 = vmul.f32 0.088388346, %v283_v63  ;;  %v201_v4 = vmul.f32 0.088388346, %v295_v0 }
 0x109   :  { %v285_v5 = vpop.f32.mrf.mxu0  ;;  %v297_v6 = vpop.f32.mrf.mxu1 }
 0x10a   :  { %v212_v7 = vadd.f32 %v245_v54, %v197_v3  ;;  %v216_v8 = vadd.f32 %v245_v54, %v201_v4  ;;  %v286_v9 = vadd.f32 %v285_v5, %v284_v1  ;;  %v298_v10 = vadd.f32 %v297_v6, %v296_v2 }
 0x10b   :  { %v287_v11 = vpop.f32.mrf.mxu0  ;;  %v299_v12 = vpop.f32.mrf.mxu1 }
 0x10c   :  { %220 = vst [vmem:[#allocation7 + $0x8] sm:$0xff] %v212_v7  ;;  %224 = vst [vmem:[#allocation7 + $0x28] sm:$0xff] %v216_v8  ;;  %v198_v13 = vmul.f32 0.088388346, %v286_v9  ;;  %v202_v14 = vmul.f32 0.088388346, %v298_v10 }
 0x10d   :  { %v288_v15 = vpop.f32.mrf.mxu0  ;;  %v300_v16 = vpop.f32.mrf.mxu1 }
 0x10e   :  { %v213_v17 = vadd.f32 %v245_v54, %v198_v13  ;;  %v217_v18 = vadd.f32 %v245_v54, %v202_v14  ;;  %v289_v19 = vadd.f32 %v288_v15, %v287_v11  ;;  %v301_v20 = vadd.f32 %v300_v16, %v299_v12 }
 0x110   :  { %221 = vst [vmem:[#allocation7 + $0x10] sm:$0xff] %v213_v17  ;;  %225 = vst [vmem:[#allocation7 + $0x30] sm:$0xff] %v217_v18  ;;  %v199_v21 = vmul.f32 0.088388346, %v289_v19  ;;  %v203_v22 = vmul.f32 0.088388346, %v301_v20 }
 0x112   :  { %v214_v23 = vadd.f32 %v245_v54, %v199_v21  ;;  %v218_v24 = vadd.f32 %v245_v54, %v203_v22 }
 0x114   :  { %222 = vst [vmem:[#allocation7 + $0x18] sm:$0xff] %v214_v23  ;;  %226 = vst [vmem:[#allocation7 + $0x38] sm:$0xff] %v218_v24 }
 0x115   :  { %392 = shalt.err (!%p389_p0)
}
 0x116   :  { %238 = dma.vmem_to_hbm [thread:$0]  %s233_s26, 1024, %s455_s3, [#allocation4], %s411_s22, %s411_s22, %s412_s23  }
 0x117   :  { %405 = dma.done.wait [#allocation4], 1024  }
 0x118   :  { %406 = vsyncadd [#allocation4], 4294966272 }
 0x119   :  { %242 = vsyncpa [#allocation3], 1 }
 0x11a   :  { %243 = vsyncpa [#allocation6], 1 }
 0x11b   :  { %244 = vsyncpa [#allocation4], 1 }

</bundles_post_ra>
